<compile_context>
chip_gen: v7x
topology: tpu7x:2x2x1
jax: 0.10.0
libtpu: 0.0.40
codegen_flags: <defaults>
</compile_context>

<pallas_src>
import jax
import jax.numpy as jnp
from jax.experimental import pallas as pl
from jax.experimental.pallas import tpu as pltpu


def _round_up(x, m):
    return (x + m - 1) // m * m


def _make_mlp_kernel(use_relu):
    if use_relu:
        act = lambda h: jnp.maximum(h, jnp.zeros((), h.dtype))
    else:
        act = jnp.tanh

    def _mlp_kernel(x_ref,
                    w1_ref, b1_ref,
                    w2_ref, b2_ref,
                    w3_ref, b3_ref,
                    w4_ref, b4_ref,
                    w5_ref, b5_ref,
                    o_ref):
        # Layers 1-3: bf16 matmul, f32 accumulate + f32 bias, bf16 activation.
        h = (jnp.dot(x_ref[...], w1_ref[...],
                     preferred_element_type=jnp.float32) + b1_ref[...])
        h = act(h.astype(jnp.bfloat16))
        h = (jnp.dot(h, w2_ref[...],
                     preferred_element_type=jnp.float32) + b2_ref[...])
        h = act(h.astype(jnp.bfloat16))
        h = (jnp.dot(h, w3_ref[...],
                     preferred_element_type=jnp.float32) + b3_ref[...])
        h = act(h.astype(jnp.bfloat16))
        # Layers 4-5: no activation; keep intermediates bf16 (relieves v5e's
        # single vst slot / vreg pressure at the (TM,256) width).
        h = (jnp.dot(h, w4_ref[...],
                     preferred_element_type=jnp.float32) + b4_ref[...]
             ).astype(jnp.bfloat16)
        h = (jnp.dot(h, w5_ref[...],
                     preferred_element_type=jnp.float32) + b5_ref[...])
        o_ref[...] = h.astype(o_ref.dtype)   # bf16 lane-dense store

    return _mlp_kernel


def _const_spec(shape):
    # Whole array as one block, same block every grid step -> VMEM-resident.
    return pl.BlockSpec(shape, lambda i: tuple(0 for _ in shape))


def _pick_tile(B):
    """Row-tile selection: amortize step overhead, feed both v7x cores,
    bound padding waste, keep VMEM tiny."""
    if B <= 512:
        # Single tile; 16-row alignment for clean bf16 sublane packing.
        return _round_up(max(B, 16), 16)
    # Target ~8 grid steps (v7x: 2 TCs x >=4 steps of double-buffering),
    # 256-row granularity (fills 2x256^2 / 4x128^2 MXUs), cap at 2048.
    return min(2048, _round_up(pl.cdiv(B, 8), 256))


def fastnn_forward(s, a, params, activation_fun='Tahn'):
    """Pallas implementation of FastNN.forward(s, a).

    s: [B, s_dim], a: [B, a_dim]  ->  [1, B, output_size]
    (matches torch.cat([s, a], -1).unsqueeze(0) followed by the MLP).
    """
    use_relu = (activation_fun == 'Relu')

    B = s.shape[0]
    (w1, b1), (w2, b2), (w3, b3), (w4, b4), (w5, b5) = params
    out_dim = w5.shape[1]
    out_pad = _round_up(out_dim, 128)

    TM = _pick_tile(B)
    B_pad = _round_up(B, TM)
    grid = (B_pad // TM,)

    # Operand prep (constant-folds / fuses under jit):
    #  - fuse the torch cat([s, a], -1) into the pad+cast copy (free),
    #  - bf16 weights/inputs, f32 biases,
    #  - lane-dense (zero-padded to 128 cols) last layer.
    x = jnp.concatenate([s, a], axis=-1).astype(jnp.bfloat16)
    x_p = jnp.pad(x, ((0, B_pad - B), (0, 0)))
    in_dim = x_p.shape[1]

    w1_bf, w2_bf, w3_bf, w4_bf = (w.astype(jnp.bfloat16)
                                  for w in (w1, w2, w3, w4))
    w5_bf = jnp.pad(w5.astype(jnp.bfloat16), ((0, 0), (0, out_pad - out_dim)))
    b5_p = jnp.pad(b5, ((0, 0), (0, out_pad - out_dim)))

    operands = (x_p,
                w1_bf, b1,
                w2_bf, b2,
                w3_bf, b3,
                w4_bf, b4,
                w5_bf, b5_p)

    in_specs = [pl.BlockSpec((TM, in_dim), lambda i: (i, 0))] + \
               [_const_spec(op.shape) for op in operands[1:]]

    out = pl.pallas_call(
        _make_mlp_kernel(use_relu),
        out_shape=jax.ShapeDtypeStruct((B_pad, out_pad), jnp.bfloat16),
        grid=grid,
        in_specs=in_specs,
        out_specs=pl.BlockSpec((TM, out_pad), lambda i: (i, 0)),
        compiler_params=pltpu.CompilerParams(
            dimension_semantics=("parallel",)),
    )(*operands)

    # Drop row / lane padding, upcast to f32, then unsqueeze(0) as in torch.
    # NOTE: bf16 writeback -> ~3 decimal digits of output precision.
    return out[:B, :out_dim].astype(jnp.float32)[None, :, :]


def init_fastnn_params(key, input_size, output_size):
    """PyTorch-Linear-style init: U(-1/sqrt(fan_in), 1/sqrt(fan_in)).

    Weights stored as [in, out] so the kernel computes x @ W + b directly
    (equivalent to torch's x @ W.T + b with W of shape [out, in]).
    """
    dims = [(input_size, 128), (128, 128), (128, 256), (256, 128),
            (128, output_size)]
    params = []
    for (fan_in, fan_out) in dims:
        key, kw, kb = jax.random.split(key, 3)
        bound = 1.0 / jnp.sqrt(float(fan_in))
        w = jax.random.uniform(kw, (fan_in, fan_out), jnp.float32, -bound, bound)
        # bias kept 2-D [1, fan_out] for clean TPU layout / broadcast in-kernel
        b = jax.random.uniform(kb, (1, fan_out), jnp.float32, -bound, bound)
        params.append((w, b))
    return params


def fastnn_reference(s, a, params, activation_fun='Tahn'):
    """Plain-JAX f32 reference for correctness checking."""
    act = jax.nn.relu if activation_fun == 'Relu' else jnp.tanh
    x = jnp.concatenate([s, a], axis=-1)[None, ...]
    (w1, b1), (w2, b2), (w3, b3), (w4, b4), (w5, b5) = params
    x = act(x @ w1 + b1)
    x = act(x @ w2 + b2)
    x = act(x @ w3 + b3)
    x = x @ w4 + b4
    x = x @ w5 + b5
    return x


if __name__ == "__main__":
    key = jax.random.PRNGKey(0)
    k_s, k_a, k_p, k_s2, k_a2 = jax.random.split(key, 5)

    # Small shapes: state dim 24, action dim 8 -> input_size = 32, output = 8
    B, s_dim, a_dim, out_size = 8, 24, 8, 8
    input_size = s_dim + a_dim

    s = jax.random.normal(k_s, (B, s_dim), jnp.float32)
    a = jax.random.normal(k_a, (B, a_dim), jnp.float32)
    params = init_fastnn_params(k_p, input_size, out_size)

    y = jax.block_until_ready(fastnn_forward(s, a, params))
    y_ref = fastnn_reference(s, a, params)
    assert y.shape == (1, B, out_size), y.shape
    # bf16 MXU feed / bf16 activations / bf16 writeback -> loose tolerance
    # vs. the f32 reference.
    assert jnp.allclose(y, y_ref, atol=5e-2, rtol=5e-2), "mismatch vs reference"

    # Larger batch exercises the multi-step row grid (TM selection, padding,
    # "parallel" sharding); batching many evaluations into one call is the
    # intended usage pattern.
    B2 = 1000
    s2 = jax.random.normal(k_s2, (B2, s_dim), jnp.float32)
    a2 = jax.random.normal(k_a2, (B2, a_dim), jnp.float32)
    y2 = jax.block_until_ready(fastnn_forward(s2, a2, params))
    y2_ref = fastnn_reference(s2, a2, params)
    assert y2.shape == (1, B2, out_size), y2.shape
    assert jnp.allclose(y2, y2_ref, atol=5e-2, rtol=5e-2), "mismatch (batched)"

    # Relu branch of the module (activation_fun='Relu').
    y3 = jax.block_until_ready(fastnn_forward(s, a, params, activation_fun='Relu'))
    y3_ref = fastnn_reference(s, a, params, activation_fun='Relu')
    assert jnp.allclose(y3, y3_ref, atol=5e-2, rtol=5e-2), "mismatch (relu)"

    print("KERNEL_OK")
</pallas_src>

<mosaic_0001>
module attributes {stable_mosaic.version = 11 : i64} {
  func.func @_mlp_kernel(%arg0: i32, %arg1: memref<16x32xbf16, #tpu.memory_space<vmem>>, %arg2: memref<32x128xbf16, #tpu.memory_space<vmem>>, %arg3: memref<1x128xf32, #tpu.memory_space<vmem>>, %arg4: memref<128x128xbf16, #tpu.memory_space<vmem>>, %arg5: memref<1x128xf32, #tpu.memory_space<vmem>>, %arg6: memref<128x256xbf16, #tpu.memory_space<vmem>>, %arg7: memref<1x256xf32, #tpu.memory_space<vmem>>, %arg8: memref<256x128xbf16, #tpu.memory_space<vmem>>, %arg9: memref<1x128xf32, #tpu.memory_space<vmem>>, %arg10: memref<128x128xbf16, #tpu.memory_space<vmem>>, %arg11: memref<1x128xf32, #tpu.memory_space<vmem>>, %arg12: memref<16x128xbf16, #tpu.memory_space<vmem>>) attributes {dimension_semantics = [#tpu.dimension_semantics<parallel>], iteration_bounds = array<i64: 1>, scalar_prefetch = 0 : i64, scratch_operands = 0 : i64, tpu.core_type = #tpu.core_type<tc>, window_params = [{transform_indices = @transform_0, window_bounds = array<i64: 16, 32>}, {pipeline_mode = #tpu.pipeline_mode<synchronous>, transform_indices = @transform_1, window_bounds = array<i64: 32, 128>}, {pipeline_mode = #tpu.pipeline_mode<synchronous>, transform_indices = @transform_2, window_bounds = array<i64: 1, 128>}, {pipeline_mode = #tpu.pipeline_mode<synchronous>, transform_indices = @transform_3, window_bounds = array<i64: 128, 128>}, {pipeline_mode = #tpu.pipeline_mode<synchronous>, transform_indices = @transform_4, window_bounds = array<i64: 1, 128>}, {pipeline_mode = #tpu.pipeline_mode<synchronous>, transform_indices = @transform_5, window_bounds = array<i64: 128, 256>}, {pipeline_mode = #tpu.pipeline_mode<synchronous>, transform_indices = @transform_6, window_bounds = array<i64: 1, 256>}, {pipeline_mode = #tpu.pipeline_mode<synchronous>, transform_indices = @transform_7, window_bounds = array<i64: 256, 128>}, {pipeline_mode = #tpu.pipeline_mode<synchronous>, transform_indices = @transform_8, window_bounds = array<i64: 1, 128>}, {pipeline_mode = #tpu.pipeline_mode<synchronous>, transform_indices = @transform_9, window_bounds = array<i64: 128, 128>}, {pipeline_mode = #tpu.pipeline_mode<synchronous>, transform_indices = @transform_10, window_bounds = array<i64: 1, 128>}, {transform_indices = @transform_11, window_bounds = array<i64: 16, 128>}]} {
    %c0 = arith.constant 0 : index
    %c0_0 = arith.constant 0 : index
    %0 = vector.load %arg1[%c0, %c0_0] : memref<16x32xbf16, #tpu.memory_space<vmem>>, vector<16x32xbf16>
    %c0_1 = arith.constant 0 : index
    %c0_2 = arith.constant 0 : index
    %1 = vector.load %arg2[%c0_1, %c0_2] : memref<32x128xbf16, #tpu.memory_space<vmem>>, vector<32x128xbf16>
    %cst = arith.constant dense<0.000000e+00> : vector<16x128xf32>
    %2 = tpu.matmul %0, %1, %cst {dimension_numbers = #tpu.dot_dimension_numbers<[1], [0], [0], [1], [0, 0, 1, 1], [], []>} : vector<16x32xbf16>, vector<32x128xbf16>, vector<16x128xf32> -> vector<16x128xf32>
    %c0_3 = arith.constant 0 : index
    %c0_4 = arith.constant 0 : index
    %3 = vector.load %arg3[%c0_3, %c0_4] : memref<1x128xf32, #tpu.memory_space<vmem>>, vector<1x128xf32>
    %4 = vector.broadcast %3 : vector<1x128xf32> to vector<16x128xf32>
    %5 = arith.addf %2, %4 : vector<16x128xf32>
    %6 = arith.truncf %5 : vector<16x128xf32> to vector<16x128xbf16>
    %7 = math.tanh %6 : vector<16x128xbf16>
    %c0_5 = arith.constant 0 : index
    %c0_6 = arith.constant 0 : index
    %8 = vector.load %arg4[%c0_5, %c0_6] : memref<128x128xbf16, #tpu.memory_space<vmem>>, vector<128x128xbf16>
    %cst_7 = arith.constant dense<0.000000e+00> : vector<16x128xf32>
    %9 = tpu.matmul %7, %8, %cst_7 {dimension_numbers = #tpu.dot_dimension_numbers<[1], [0], [0], [1], [0, 0, 1, 1], [], []>} : vector<16x128xbf16>, vector<128x128xbf16>, vector<16x128xf32> -> vector<16x128xf32>
    %c0_8 = arith.constant 0 : index
    %c0_9 = arith.constant 0 : index
    %10 = vector.load %arg5[%c0_8, %c0_9] : memref<1x128xf32, #tpu.memory_space<vmem>>, vector<1x128xf32>
    %11 = vector.broadcast %10 : vector<1x128xf32> to vector<16x128xf32>
    %12 = arith.addf %9, %11 : vector<16x128xf32>
    %13 = arith.truncf %12 : vector<16x128xf32> to vector<16x128xbf16>
    %14 = math.tanh %13 : vector<16x128xbf16>
    %c0_10 = arith.constant 0 : index
    %c0_11 = arith.constant 0 : index
    %15 = vector.load %arg6[%c0_10, %c0_11] : memref<128x256xbf16, #tpu.memory_space<vmem>>, vector<128x256xbf16>
    %cst_12 = arith.constant dense<0.000000e+00> : vector<16x256xf32>
    %16 = tpu.matmul %14, %15, %cst_12 {dimension_numbers = #tpu.dot_dimension_numbers<[1], [0], [0], [1], [0, 0, 1, 1], [], []>} : vector<16x128xbf16>, vector<128x256xbf16>, vector<16x256xf32> -> vector<16x256xf32>
    %c0_13 = arith.constant 0 : index
    %c0_14 = arith.constant 0 : index
    %17 = vector.load %arg7[%c0_13, %c0_14] : memref<1x256xf32, #tpu.memory_space<vmem>>, vector<1x256xf32>
    %18 = vector.broadcast %17 : vector<1x256xf32> to vector<16x256xf32>
    %19 = arith.addf %16, %18 : vector<16x256xf32>
    %20 = arith.truncf %19 : vector<16x256xf32> to vector<16x256xbf16>
    %21 = math.tanh %20 : vector<16x256xbf16>
    %c0_15 = arith.constant 0 : index
    %c0_16 = arith.constant 0 : index
    %22 = vector.load %arg8[%c0_15, %c0_16] : memref<256x128xbf16, #tpu.memory_space<vmem>>, vector<256x128xbf16>
    %cst_17 = arith.constant dense<0.000000e+00> : vector<16x128xf32>
    %23 = tpu.matmul %21, %22, %cst_17 {dimension_numbers = #tpu.dot_dimension_numbers<[1], [0], [0], [1], [0, 0, 1, 1], [], []>} : vector<16x256xbf16>, vector<256x128xbf16>, vector<16x128xf32> -> vector<16x128xf32>
    %c0_18 = arith.constant 0 : index
    %c0_19 = arith.constant 0 : index
    %24 = vector.load %arg9[%c0_18, %c0_19] : memref<1x128xf32, #tpu.memory_space<vmem>>, vector<1x128xf32>
    %25 = vector.broadcast %24 : vector<1x128xf32> to vector<16x128xf32>
    %26 = arith.addf %23, %25 : vector<16x128xf32>
    %27 = arith.truncf %26 : vector<16x128xf32> to vector<16x128xbf16>
    %c0_20 = arith.constant 0 : index
    %c0_21 = arith.constant 0 : index
    %28 = vector.load %arg10[%c0_20, %c0_21] : memref<128x128xbf16, #tpu.memory_space<vmem>>, vector<128x128xbf16>
    %cst_22 = arith.constant dense<0.000000e+00> : vector<16x128xf32>
    %29 = tpu.matmul %27, %28, %cst_22 {dimension_numbers = #tpu.dot_dimension_numbers<[1], [0], [0], [1], [0, 0, 1, 1], [], []>} : vector<16x128xbf16>, vector<128x128xbf16>, vector<16x128xf32> -> vector<16x128xf32>
    %c0_23 = arith.constant 0 : index
    %c0_24 = arith.constant 0 : index
    %30 = vector.load %arg11[%c0_23, %c0_24] : memref<1x128xf32, #tpu.memory_space<vmem>>, vector<1x128xf32>
    %31 = vector.broadcast %30 : vector<1x128xf32> to vector<16x128xf32>
    %32 = arith.addf %29, %31 : vector<16x128xf32>
    %33 = arith.truncf %32 : vector<16x128xf32> to vector<16x128xbf16>
    %c0_25 = arith.constant 0 : index
    %c0_26 = arith.constant 0 : index
    %34 = vector.load %arg12[%c0_25, %c0_26] : memref<16x128xbf16, #tpu.memory_space<vmem>>, vector<16x128xbf16>
    tpu.vector_store %arg12[%c0_25, %c0_26], %33 {strides = array<i32>} : memref<16x128xbf16, #tpu.memory_space<vmem>>, vector<16x128xbf16>,
    return
  }
  func.func @transform_0(%arg0: i32) -> (i32, i32) {
    %c0_i32 = arith.constant 0 : i32
    %c0_i32_0 = arith.constant 0 : i32
    return %arg0, %c0_i32 : i32, i32
  }
  func.func @transform_1(%arg0: i32) -> (i32, i32) {
    %c0_i32 = arith.constant 0 : i32
    %c0_i32_0 = arith.constant 0 : i32
    %c0_i32_1 = arith.constant 0 : i32
    return %c0_i32, %c0_i32_0 : i32, i32
  }
  func.func @transform_2(%arg0: i32) -> (i32, i32) {
    %c0_i32 = arith.constant 0 : i32
    %c0_i32_0 = arith.constant 0 : i32
    %c0_i32_1 = arith.constant 0 : i32
    return %c0_i32, %c0_i32_0 : i32, i32
  }
  func.func @transform_3(%arg0: i32) -> (i32, i32) {
    %c0_i32 = arith.constant 0 : i32
    %c0_i32_0 = arith.constant 0 : i32
    %c0_i32_1 = arith.constant 0 : i32
    return %c0_i32, %c0_i32_0 : i32, i32
  }
  func.func @transform_4(%arg0: i32) -> (i32, i32) {
    %c0_i32 = arith.constant 0 : i32
    %c0_i32_0 = arith.constant 0 : i32
    %c0_i32_1 = arith.constant 0 : i32
    return %c0_i32, %c0_i32_0 : i32, i32
  }
  func.func @transform_5(%arg0: i32) -> (i32, i32) {
    %c0_i32 = arith.constant 0 : i32
    %c0_i32_0 = arith.constant 0 : i32
    %c0_i32_1 = arith.constant 0 : i32
    return %c0_i32, %c0_i32_0 : i32, i32
  }
  func.func @transform_6(%arg0: i32) -> (i32, i32) {
    %c0_i32 = arith.constant 0 : i32
    %c0_i32_0 = arith.constant 0 : i32
    %c0_i32_1 = arith.constant 0 : i32
    return %c0_i32, %c0_i32_0 : i32, i32
  }
  func.func @transform_7(%arg0: i32) -> (i32, i32) {
    %c0_i32 = arith.constant 0 : i32
    %c0_i32_0 = arith.constant 0 : i32
    %c0_i32_1 = arith.constant 0 : i32
    return %c0_i32, %c0_i32_0 : i32, i32
  }
  func.func @transform_8(%arg0: i32) -> (i32, i32) {
    %c0_i32 = arith.constant 0 : i32
    %c0_i32_0 = arith.constant 0 : i32
    %c0_i32_1 = arith.constant 0 : i32
    return %c0_i32, %c0_i32_0 : i32, i32
  }
  func.func @transform_9(%arg0: i32) -> (i32, i32) {
    %c0_i32 = arith.constant 0 : i32
    %c0_i32_0 = arith.constant 0 : i32
    %c0_i32_1 = arith.constant 0 : i32
    return %c0_i32, %c0_i32_0 : i32, i32
  }
  func.func @transform_10(%arg0: i32) -> (i32, i32) {
    %c0_i32 = arith.constant 0 : i32
    %c0_i32_0 = arith.constant 0 : i32
    %c0_i32_1 = arith.constant 0 : i32
    return %c0_i32, %c0_i32_0 : i32, i32
  }
  func.func @transform_11(%arg0: i32) -> (i32, i32) {
    %c0_i32 = arith.constant 0 : i32
    %c0_i32_0 = arith.constant 0 : i32
    return %arg0, %c0_i32 : i32, i32
  }
}

</mosaic_0001>

<bundles_post_ra>
// kernel: tpu_custom_call.1
= control target key start
LH: loop header
LB: loop body
LE: loop exit
PB: predicated region body
PF: predicated region fallthrough
CT: control target
= control target key end

     0   :  { %16 = vsyncpa [#allocation3], 0  ;;  %s1424_s0 = inlined_call_operand.hbm [shape: bf16[16,32], index: 0, kind: input, shape index: {}]   ;;  %s1425_s1 = inlined_call_operand.hbm [shape: bf16[32,128], index: 1, kind: input, shape index: {}]   ;;  %s1426_s2 = inlined_call_operand.vmem [shape: f32[1,128], index: 2, kind: input, shape index: {}]   ;;  %s1427_s3 = inlined_call_operand.hbm [shape: bf16[128,128], index: 3, kind: input, shape index: {}]   ;;  %s1428_s4 = inlined_call_operand.vmem [shape: f32[1,128], index: 4, kind: input, shape index: {}]   ;;  %s1429_s5 = inlined_call_operand.hbm [shape: bf16[128,256], index: 5, kind: input, shape index: {}]   ;;  %s1430_s6 = inlined_call_operand.vmem [shape: f32[1,256], index: 6, kind: input, shape index: {}]   ;;  %s1431_s7 = inlined_call_operand.hbm [shape: bf16[256,128], index: 7, kind: input, shape index: {}]   ;;  %s1432_s8 = inlined_call_operand.vmem [shape: f32[1,128], index: 8, kind: input, shape index: {}]   ;;  %s1433_s9 = inlined_call_operand.hbm [shape: bf16[128,128], index: 9, kind: input, shape index: {}]   ;;  %s1434_s10 = inlined_call_operand.vmem [shape: f32[1,128], index: 10, kind: input, shape index: {}]   ;;  %s1435_s11 = inlined_call_operand.hbm [shape: bf16[16,128], index: 11, kind: output, shape index: {}]  }
   0x1   :  { %17 = vsyncpa [#allocation6], 0 }
   0x2   :  { %18 = vsyncpa [#allocation9], 0 }
   0x3   :  { %19 = vsyncpa [#allocation12], 0 }
   0x4   :  { %20 = vsyncpa [#allocation4], 0  ;;  %s1188_s17 = smov [#allocation5]   ;;  %s1189_s19 = smov [#allocation8]  }
   0x5   :  { %s38_s18 = sshll.u32 %s1188_s17, 4  ;;  %s66_s20 = sshll.u32 %s1189_s19, 4  ;;  %s39_s18 = int_to_ptr.vmem [resolvable:$true] %s38_s18  ;;  %s1262_s20 = int_to_ptr.vmem [resolvable:$true] %s66_s20 }
   0x6   :  { %s1024_s23 = scalar_lea.hbm %s1425_s1, 256 }
   0x7   :  { %p1025_p0 = scmp.ne.s32.totalorder %s1425_s1, %s1024_s23  ;;  %p1028_p1 = scmp.lt.u32.totalorder %s1024_s23, %s1425_s1 }
   0x9   :  { %p1030_p2 = pnand %p1028_p1, %p1025_p0 }
   0xb   :  { %1033 = shalt.err (!%p1030_p2)
}
   0xc   :  { %s1034_s28 = scalar_lea.vmem %s39_s18, 256  ;;  %p1039_p4 = scmp.lt.s32.totalorder %s39_s18, %s39_s18 }
   0xd   :  { %p1035_p3 = scmp.ne.s32.totalorder %s39_s18, %s1034_s28  ;;  %p1040_p5 = scmp.lt.s32.totalorder %s1034_s28, %s1034_s28 }
   0xf   :  { %p1041_p6 = por %p1040_p5, %p1039_p4 }
  0x11   :  { %p1042_p7 = pnand %p1041_p6, %p1035_p3 }
  0x13   :  { %1045 = shalt.err (!%p1042_p7)
}
  0x14   :  { %s1190_s29 = smov 64   ;;  %s1191_s30 = smov 4  }
  0x15   :  { %44 = dma.hbm_to_vmem [thread:$0]  %s1425_s1, 256, %s39_s18, [#allocation6], %s1190_s29, %s1190_s29, %s1191_s30  }
  0x16   :  { %s1046_s16 = scalar_lea.hbm %s1429_s5, 2048 }
  0x17   :  { %p1047_p8 = scmp.ne.s32.totalorder %s1429_s5, %s1046_s16  ;;  %p1050_p9 = scmp.lt.u32.totalorder %s1046_s16, %s1429_s5 }
  0x19   :  { %p1052_p10 = pnand %p1050_p9, %p1047_p8 }
  0x1b   :  { %1055 = shalt.err (!%p1052_p10)
}
  0x1c   :  { %s1056_s23 = scalar_lea.vmem %s1262_s20, 2048  ;;  %p1061_p12 = scmp.lt.s32.totalorder %s1262_s20, %s1262_s20 }
  0x1d   :  { %p1057_p11 = scmp.ne.s32.totalorder %s1262_s20, %s1056_s23  ;;  %p1062_p13 = scmp.lt.s32.totalorder %s1056_s23, %s1056_s23 }
  0x1f   :  { %p1063_p0 = por %p1062_p13, %p1061_p12 }
  0x21   :  { %p1064_p1 = pnand %p1063_p0, %p1057_p11 }
  0x23   :  { %1067 = shalt.err (!%p1064_p1)
}
  0x24   :  { %s1192_s1 = smov 128   ;;  %s1193_s18 = smov 8  }
  0x25   :  { %72 = dma.hbm_to_vmem [thread:$0]  %s1429_s5, 2048, %s1262_s20, [#allocation9], %s1192_s1, %s1192_s1, %s1193_s18  }
  0x26   :  { %s1194_s26 = smov [#allocation2]   ;;  %s1195_s28 = smov [#allocation7]  }
  0x27   :  { %s26_s27 = sshll.u32 %s1194_s26, 4  ;;  %s52_s12 = sshll.u32 %s1195_s28, 4  ;;  %s27_s27 = int_to_ptr.vmem [resolvable:$true] %s26_s27  ;;  %s1296_s12 = int_to_ptr.vmem [resolvable:$true] %s52_s12 }
  0x28   :  { %s1068_s15 = scalar_lea.hbm %s1424_s0, 128 }
  0x29   :  { %p1069_p2 = scmp.ne.s32.totalorder %s1424_s0, %s1068_s15  ;;  %p1072_p3 = scmp.lt.u32.totalorder %s1068_s15, %s1424_s0 }
  0x2b   :  { %p1074_p4 = pnand %p1072_p3, %p1069_p2 }
  0x2d   :  { %1077 = shalt.err (!%p1074_p4)
}
  0x2e   :  { %s1078_s5 = scalar_lea.vmem %s27_s27, 128  ;;  %p1083_p6 = scmp.lt.s32.totalorder %s27_s27, %s27_s27 }
  0x2f   :  { %p1079_p5 = scmp.ne.s32.totalorder %s27_s27, %s1078_s5  ;;  %p1084_p7 = scmp.lt.s32.totalorder %s1078_s5, %s1078_s5 }
  0x31   :  { %p1085_p8 = por %p1084_p7, %p1083_p6 }
  0x33   :  { %p1086_p9 = pnand %p1085_p8, %p1079_p5 }
  0x35   :  { %1089 = shalt.err (!%p1086_p9)
}
  0x36   :  { %32 = dma.hbm_to_vmem [thread:$0]  %s1424_s0, 128, %s27_s27, [#allocation3], %s1190_s29, %s1190_s29, %s1191_s30  }
  0x37   :  { %s1090_s18 = scalar_lea.hbm %s1427_s3, 1024 }
  0x38   :  { %p1091_p10 = scmp.ne.s32.totalorder %s1427_s3, %s1090_s18  ;;  %p1094_p11 = scmp.lt.u32.totalorder %s1090_s18, %s1427_s3 }
  0x3a   :  { %p1096_p12 = pnand %p1094_p11, %p1091_p10 }
  0x3c   :  { %1099 = shalt.err (!%p1096_p12)
}
  0x3d   :  { %s1100_s13 = scalar_lea.vmem %s1296_s12, 1024  ;;  %p1105_p0 = scmp.lt.s32.totalorder %s1296_s12, %s1296_s12 }
  0x3e   :  { %p1101_p13 = scmp.ne.s32.totalorder %s1296_s12, %s1100_s13  ;;  %p1106_p1 = scmp.lt.s32.totalorder %s1100_s13, %s1100_s13 }
  0x40   :  { %p1107_p2 = por %p1106_p1, %p1105_p0 }
  0x42   :  { %p1108_p3 = pnand %p1107_p2, %p1101_p13 }
  0x44   :  { %1111 = shalt.err (!%p1108_p3)
}
  0x45   :  { %58 = dma.hbm_to_vmem [thread:$0]  %s1427_s3, 1024, %s1296_s12, [#allocation6], %s1190_s29, %s1190_s29, %s1191_s30  }
  0x46   :  { %s1196_s14 = smov [#allocation10]   ;;  %s1197_s16 = smov [#allocation11]  }
  0x47   :  { %s80_s15 = sshll.u32 %s1196_s14, 4  ;;  %s94_s17 = sshll.u32 %s1197_s16, 4  ;;  %s81_s15 = int_to_ptr.vmem [resolvable:$true] %s80_s15  ;;  %s1333_s17 = int_to_ptr.vmem [resolvable:$true] %s94_s17 }
  0x48   :  { %s1112_s5 = scalar_lea.hbm %s1431_s7, 2048 }
  0x49   :  { %p1113_p4 = scmp.ne.s32.totalorder %s1431_s7, %s1112_s5  ;;  %p1116_p5 = scmp.lt.u32.totalorder %s1112_s5, %s1431_s7 }
  0x4b   :  { %p1118_p6 = pnand %p1116_p5, %p1113_p4 }
  0x4d   :  { %1121 = shalt.err (!%p1118_p6)
}
  0x4e   :  { %s1122_s3 = scalar_lea.vmem %s81_s15, 2048  ;;  %p1127_p8 = scmp.lt.s32.totalorder %s81_s15, %s81_s15 }
  0x4f   :  { %p1123_p7 = scmp.ne.s32.totalorder %s81_s15, %s1122_s3  ;;  %p1128_p9 = scmp.lt.s32.totalorder %s1122_s3, %s1122_s3 }
  0x51   :  { %p1129_p10 = por %p1128_p9, %p1127_p8 }
  0x53   :  { %p1130_p11 = pnand %p1129_p10, %p1123_p7 }
  0x55   :  { %1133 = shalt.err (!%p1130_p11)
}
  0x56   :  { %86 = dma.hbm_to_vmem [thread:$0]  %s1431_s7, 2048, %s81_s15, [#allocation9], %s1190_s29, %s1190_s29, %s1191_s30  }
  0x57   :  { %s1134_s26 = scalar_lea.hbm %s1433_s9, 1024 }
  0x58   :  { %p1135_p12 = scmp.ne.s32.totalorder %s1433_s9, %s1134_s26  ;;  %p1138_p13 = scmp.lt.u32.totalorder %s1134_s26, %s1433_s9 }
  0x5a   :  { %p1140_p0 = pnand %p1138_p13, %p1135_p12 }
  0x5c   :  { %1143 = shalt.err (!%p1140_p0)
}
  0x5d   :  { %s1144_s14 = scalar_lea.vmem %s1333_s17, 1024  ;;  %p1149_p2 = scmp.lt.s32.totalorder %s1333_s17, %s1333_s17 }
  0x5e   :  { %p1145_p1 = scmp.ne.s32.totalorder %s1333_s17, %s1144_s14  ;;  %p1150_p3 = scmp.lt.s32.totalorder %s1144_s14, %s1144_s14 }
  0x60   :  { %p1151_p4 = por %p1150_p3, %p1149_p2 }
  0x62   :  { %p1152_p5 = pnand %p1151_p4, %p1145_p1 }
  0x64   :  { %1155 = shalt.err (!%p1152_p5)
}
  0x65   :  { %100 = dma.hbm_to_vmem [thread:$0]  %s1433_s9, 1024, %s1333_s17, [#allocation12], %s1190_s29, %s1190_s29, %s1191_s30  }
  0x66   :  { %1178 = dma.done.wait [#allocation3], 128  }
  0x67   :  { %1179 = vsyncadd [#allocation3], 4294967168 }
  0x68   :  { %1180 = dma.done.wait [#allocation6], 1280  }
  0x69   :  { %1181 = vsyncadd [#allocation6], 4294966016 }
  0x6a   :  { %1182 = dma.done.wait [#allocation9], 4096  }
  0x6b   :  { %1183 = vsyncadd [#allocation9], 4294963200 }
  0x6c   :  { %1184 = dma.done.wait [#allocation12], 1024  }
  0x6d   :  { %1185 = vsyncadd [#allocation12], 4294966272  ;;  %v1198_v0 = vmov 0.0   ;;  %vm1199_vm0 = vmmov 0   ;;  %v957_v1 = vld [vmem:[#allocation5] sm:$0xff]   ;;  %v958_v2 = vld [vmem:[#allocation5 + $0x8] sm:$0xff]  }
  0x6e   :  { %895 = vmatprep.subr.bf16.mxu0 %v1198_v0  ;;  %899 = vmatprep.mubr.msk.bf16.mxu0 %vm1199_vm0, %v1198_v0  ;;  %v960_v3 = vld [vmem:[#allocation7] sm:$0xff]   ;;  %v959_v4 = vld [vmem:[#allocation2] sm:$0xff]   ;;  %vm152_vm1 = vcmask 261120   ;;  %v962_v6 = vld [vmem:[#allocation7 + $0x10] sm:$0xff]   ;;  %v1200_v36 = vmov 0   ;;  %s1201_s22 = smov [#allocation13]  }
  0x6f   :  { %903 = vmatprep.subr.bf16.mxu1 %v1198_v0  ;;  %919 = vmatprep.mubr.msk.bf16.mxu1 %vm1199_vm0, %v1198_v0  ;;  %v961_v5 = vld [vmem:[#allocation7 + $0x8] sm:$0xff]   ;;  %v963_v7 = vld [vmem:[#allocation7 + $0x18] sm:$0xff]   ;;  %v964_v8 = vld [vmem:[#allocation7 + $0x20] sm:$0xff]   ;;  %s772_s23 = sshll.u32 %s1201_s22, 4  ;;  %s773_s23 = int_to_ptr.vmem [resolvable:$true] %s772_s23 }
  0x70   :  { %896 = vmatpush3.bf16.msra.mxu0 %v957_v1  ;;  %904 = vmatpush3.bf16.msra.mxu1 %v960_v3  ;;  %v965_v9 = vld [vmem:[#allocation7 + $0x28] sm:$0xff]   ;;  %v966_v10 = vld [vmem:[#allocation7 + $0x30] sm:$0xff]   ;;  %v967_v11 = vld [vmem:[#allocation7 + $0x38] sm:$0xff]   ;;  %p1161_p7 = scmp.lt.s32.totalorder %s773_s23, %s773_s23 }
  0x71   :  { %897 = vmatprep.subr.bf16.mxu0 %v1198_v0  ;;  %905 = vmatprep.subr.bf16.mxu1 %v1198_v0  ;;  %v968_v12 = vld [vmem:[#allocation8] ss:$8 sps:$4 sm:$0xff]   ;;  %v970_v13 = vld [vmem:[#allocation8 + $0x4] ss:$8 sps:$4 sm:$0xff]   ;;  %v973_v14 = vld [vmem:[#allocation8 + $0x14] ss:$8 sps:$4 sm:$0xff]  }
  0x72   :  { %v971_v15 = vld [vmem:[#allocation8 + $0x10] ss:$8 sps:$4 sm:$0xff]   ;;  %v976_v16 = vld [vmem:[#allocation8 + $0x24] ss:$8 sps:$4 sm:$0xff]   ;;  %v974_v17 = vld [vmem:[#allocation8 + $0x20] ss:$8 sps:$4 sm:$0xff]  }
  0x73   :  { %v979_v18 = vld [vmem:[#allocation8 + $0x34] ss:$8 sps:$4 sm:$0xff]   ;;  %v977_v19 = vld [vmem:[#allocation8 + $0x30] ss:$8 sps:$4 sm:$0xff]   ;;  %v787_v20 = vld [vmem:[%s1426_s2] ss:$0 sm:$0xff] }
  0x74   :  { %898 = vmatpush3.bf16.msra.mxu0 %v958_v2  ;;  %906 = vmatpush3.bf16.msra.mxu1 %v961_v5  ;;  %v982_v29 = vld [vmem:[#allocation8 + $0x44] ss:$8 sps:$4 sm:$0xff]   ;;  %v980_v30 = vld [vmem:[#allocation8 + $0x40] ss:$8 sps:$4 sm:$0xff]   ;;  %v985_v31 = vld [vmem:[#allocation8 + $0x54] ss:$8 sps:$4 sm:$0xff]  }
  0x75   :  { %907 = vmatprep.subr.bf16.mxu1 %v1198_v0  ;;  %421 = vmatprep.subr.bf16.mxu0 %v970_v13  ;;  %v983_v32 = vld [vmem:[#allocation8 + $0x50] ss:$8 sps:$4 sm:$0xff]   ;;  %v988_v33 = vld [vmem:[#allocation8 + $0x64] ss:$8 sps:$4 sm:$0xff]   ;;  %v986_v34 = vld [vmem:[#allocation8 + $0x60] ss:$8 sps:$4 sm:$0xff]  }
  0x76   :  { %v991_v35 = vld [vmem:[#allocation8 + $0x74] ss:$8 sps:$4 sm:$0xff]   ;;  %v989_v37 = vld [vmem:[#allocation8 + $0x70] ss:$8 sps:$4 sm:$0xff]   ;;  %v992_v38 = vld [vmem:[#allocation10 + $0x40] sm:$0xff]  }
  0x77   :  { %900 = vmatmul.mubr.msk.bf16.vlgmr.msra.gmra.mrb[0].mxu0 %vm152_vm1, %v959_v4  ;;  %v993_v39 = vld [vmem:[#allocation10] sm:$0xff]   ;;  %v994_v40 = vld [vmem:[#allocation10 + $0x48] sm:$0xff]   ;;  %v996_v42 = vld [vmem:[#allocation10 + $0x50] sm:$0xff]  }
  0x78   :  { %908 = vmatpush3.bf16.msra.mxu1 %v962_v6  ;;  %422 = vmatpush1.bf16.msra.mxu0 %v968_v12  ;;  %v995_v41 = vld [vmem:[#allocation10 + $0x8] sm:$0xff]   ;;  %v997_v43 = vld [vmem:[#allocation10 + $0x10] sm:$0xff]   ;;  %v998_v53 = vld [vmem:[#allocation10 + $0x58] sm:$0xff]   ;;  %v331_v6 = vlaneseq }
  0x79   :  { %909 = vmatprep.subr.bf16.mxu1 %v1198_v0  ;;  %423 = vmatprep.subr.bf16.mxu0 %v973_v14  ;;  %v792_v44 = vld [vmem:[%s1428_s4] ss:$0 sm:$0xff]  ;;  %v999_v54 = vld [vmem:[#allocation10 + $0x18] sm:$0xff]   ;;  %v1000_v55 = vld [vmem:[#allocation10 + $0x60] sm:$0xff]  }
  0x7a   :  { %453 = vmatprep.mubr.bf16.mxu0 %v1200_v36  ;;  %v1001_v56 = vld [vmem:[#allocation10 + $0x20] sm:$0xff]   ;;  %v1002_v57 = vld [vmem:[#allocation10 + $0x68] sm:$0xff]   ;;  %v1004_v59 = vld [vmem:[#allocation10 + $0x70] sm:$0xff]  }
  0x7b   :  { %v1003_v58 = vld [vmem:[#allocation10 + $0x28] sm:$0xff]   ;;  %v1005_v60 = vld [vmem:[#allocation10 + $0x30] sm:$0xff]   ;;  %v1006_v61 = vld [vmem:[#allocation10 + $0x78] sm:$0xff]  }
  0x7c   :  { %910 = vmatpush3.bf16.msra.mxu1 %v963_v7  ;;  %424 = vmatpush1.bf16.msra.mxu0 %v971_v15  ;;  %v1007_v62 = vld [vmem:[#allocation10 + $0x38] sm:$0xff]   ;;  %v1008_v63 = vld [vmem:[#allocation11] sm:$0xff]   ;;  %v1009_v1 = vld [vmem:[#allocation11 + $0x8] sm:$0xff]   ;;  %v332_v7 = vshrl.u32 %v331_v6, 7 }
  0x7d   :  { %911 = vmatprep.subr.bf16.mxu1 %v1198_v0  ;;  %425 = vmatprep.subr.bf16.mxu0 %v976_v16  ;;  %v1010_v2 = vld [vmem:[#allocation11 + $0x10] sm:$0xff]   ;;  %v1011_v3 = vld [vmem:[#allocation11 + $0x18] sm:$0xff]   ;;  %v1012_v4 = vld [vmem:[#allocation11 + $0x20] sm:$0xff]  }
  0x7e   :  { %v1013_v5 = vld [vmem:[#allocation11 + $0x28] sm:$0xff]  }
  0x80   :  { %912 = vmatpush3.bf16.msra.mxu1 %v964_v8  ;;  %426 = vmatpush1.bf16.msra.mxu0 %v974_v17  ;;  %v333_v8 = vsub.s32 0, %v332_v7 }
  0x81   :  { %913 = vmatprep.subr.bf16.mxu1 %v1198_v0  ;;  %427 = vmatprep.subr.bf16.mxu0 %v979_v18 }
  0x84   :  { %914 = vmatpush3.bf16.msra.mxu1 %v965_v9  ;;  %428 = vmatpush1.bf16.msra.mxu0 %v977_v19  ;;  %v329_v9 = vld [vmem:[%s1430_s6] sm:$0x3] }
  0x85   :  { %915 = vmatprep.subr.bf16.mxu1 %v1198_v0  ;;  %429 = vmatprep.subr.bf16.mxu0 %v982_v29 }
  0x88   :  { %916 = vmatpush3.bf16.msra.mxu1 %v966_v10  ;;  %430 = vmatpush1.bf16.msra.mxu0 %v980_v30  ;;  %v337_v10 = vsub.s32 1, %v332_v7 }
  0x89   :  { %917 = vmatprep.subr.bf16.mxu1 %v1198_v0  ;;  %431 = vmatprep.subr.bf16.mxu0 %v985_v31  ;;  %v817_v31 = vld [vmem:[%s1432_s8] ss:$0 sm:$0xff]  ;;  %s1156_s8 = scalar_lea.vmem %s773_s23, 128 }
  0x8a   :  { %v338_v13 = vrot.slane %v329_v9, %v337_v10  ;;  %p1157_p6 = scmp.ne.s32.totalorder %s773_s23, %s1156_s8  ;;  %p1162_p8 = scmp.lt.s32.totalorder %s1156_s8, %s1156_s8 }
  0x8c   :  { %918 = vmatpush3.bf16.msra.mxu1 %v967_v11  ;;  %432 = vmatpush1.bf16.msra.mxu0 %v983_v32  ;;  %v334_v11 = vrot.slane %v329_v9, %v333_v8  ;;  %p1163_p9 = por %p1162_p8, %p1161_p7 }
  0x8d   :  { %433 = vmatprep.subr.bf16.mxu0 %v988_v33  ;;  %864 = vmatprep.subr.bf16.mxu1 %v992_v38 }
  0x8e   :  { %p1164_p10 = pnand %p1163_p9, %p1157_p6 }
  0x90   :  { %434 = vmatpush1.bf16.msra.mxu0 %v986_v34 }
  0x91   :  { %435 = vmatprep.subr.bf16.mxu0 %v991_v35 }
  0x94   :  { %436 = vmatpush1.bf16.msra.mxu0 %v989_v37 }
  0x95   :  { %923 = vmatprep.subr.bf16.mxu0 %v1198_v0 }
 0x14a   :  { %v190_v21 = vpop.f32.mrb[0].mxu0 }
 0x14b   :  { %v901_v22 = vpop.f32.mrb[1].mxu0  ;;  %v191_v24 = vadd.f32 %v787_v20, %v190_v21 }
 0x14c   :  { %v193_v23 = vpop.f32.mrb[2].mxu0 }
 0x14d   :  { %v194_v25 = vadd.f32 %v787_v20, %v193_v23  ;;  %v902_v26 = vpop.f32.mrb[3].mxu0 }
 0x14e   :  { %v1015_v26 = vld [vmem:[#allocation11 + $0x38] sm:$0xff]  }
 0x14f   :  { %v197_v27 = vpack.c.bf16 %v194_v25, %v191_v24  ;;  %v1014_v25 = vld [vmem:[#allocation11 + $0x30] sm:$0xff]  }
 0x151   :  { %1016 = vtanh.bf16 %v197_v27 }
 0x15c   :  { %v1017_v28 = vpop.eup %1016 }
 0x15d   :  { %920 = vmatmul.mubr.bf16.vlgmr.msra.gmra.mrb[0].mxu1 %v1017_v28 }
 0x15e   :  { %865 = vmatpush3.bf16.msra.mxu1 %v993_v39 }
 0x15f   :  { %866 = vmatprep.subr.bf16.mxu1 %v994_v40 }
 0x162   :  { %867 = vmatpush3.bf16.msra.mxu1 %v995_v41 }
 0x163   :  { %868 = vmatprep.subr.bf16.mxu1 %v996_v42 }
 0x166   :  { %869 = vmatpush3.bf16.msra.mxu1 %v997_v43 }
 0x167   :  { %870 = vmatprep.subr.bf16.mxu1 %v998_v53 }
 0x16a   :  { %871 = vmatpush3.bf16.msra.mxu1 %v999_v54 }
 0x16b   :  { %872 = vmatprep.subr.bf16.mxu1 %v1000_v55 }
 0x16e   :  { %873 = vmatpush3.bf16.msra.mxu1 %v1001_v56 }
 0x16f   :  { %874 = vmatprep.subr.bf16.mxu1 %v1002_v57 }
 0x172   :  { %875 = vmatpush3.bf16.msra.mxu1 %v1003_v58 }
 0x173   :  { %876 = vmatprep.subr.bf16.mxu1 %v1004_v59 }
 0x176   :  { %877 = vmatpush3.bf16.msra.mxu1 %v1005_v60 }
 0x177   :  { %878 = vmatprep.subr.bf16.mxu1 %v1006_v61 }
 0x17a   :  { %879 = vmatpush3.bf16.msra.mxu1 %v1007_v62 }
 0x230   :  { %v304_v45 = vpop.f32.mrb[0].mxu1 }
 0x231   :  { %v921_v46 = vpop.f32.mrb[1].mxu1  ;;  %v305_v48 = vadd.f32 %v792_v44, %v304_v45 }
 0x232   :  { %v307_v47 = vpop.f32.mrb[2].mxu1 }
 0x233   :  { %v308_v49 = vadd.f32 %v792_v44, %v307_v47  ;;  %v922_v50 = vpop.f32.mrb[3].mxu1 }
 0x235   :  { %v311_v51 = vpack.c.bf16 %v308_v49, %v305_v48 }
 0x237   :  { %1018 = vtanh.bf16 %v311_v51 }
 0x242   :  { %v1019_v52 = vpop.eup %1018 }
 0x243   :  { %454 = vmatmul.mubr.bf16.vlgmr.msra.gmra.mrb[4].mxu0 %v1019_v52 }
 0x244   :  { %939 = vmatprep.mubr.msk.bf16.mxu0 %vm1199_vm0, %v1198_v0  ;;  %924 = vmatpush3.bf16.msra.mxu0 %v1008_v63 }
 0x245   :  { %925 = vmatprep.subr.bf16.mxu0 %v1198_v0 }
 0x248   :  { %926 = vmatpush3.bf16.msra.mxu0 %v1009_v1 }
 0x249   :  { %927 = vmatprep.subr.bf16.mxu0 %v1198_v0 }
 0x24c   :  { %928 = vmatpush3.bf16.msra.mxu0 %v1010_v2 }
 0x24d   :  { %929 = vmatprep.subr.bf16.mxu0 %v1198_v0 }
 0x250   :  { %930 = vmatpush3.bf16.msra.mxu0 %v1011_v3 }
 0x251   :  { %931 = vmatprep.subr.bf16.mxu0 %v1198_v0 }
 0x254   :  { %932 = vmatpush3.bf16.msra.mxu0 %v1012_v4 }
 0x255   :  { %933 = vmatprep.subr.bf16.mxu0 %v1198_v0 }
 0x258   :  { %934 = vmatpush3.bf16.msra.mxu0 %v1013_v5 }
 0x259   :  { %935 = vmatprep.subr.bf16.mxu0 %v1198_v0 }
 0x25c   :  { %936 = vmatpush3.bf16.msra.mxu0 %v1014_v25 }
 0x25d   :  { %937 = vmatprep.subr.bf16.mxu0 %v1198_v0  ;;  %v834_v0 = vld [vmem:[%s1434_s10] ss:$0 sm:$0xff] }
 0x260   :  { %938 = vmatpush3.bf16.msra.mxu0 %v1015_v26 }
 0x316   :  { %v455_v12 = vpop.f32.mrb[4].mxu0 }
 0x317   :  { %v457_v14 = vpop.f32.mrb[5].mxu0  ;;  %v456_v16 = vadd.f32 %v455_v12, %v334_v11 }
 0x318   :  { %v459_v15 = vpop.f32.mrb[6].mxu0  ;;  %v458_v19 = vadd.f32 %v457_v14, %v338_v13 }
 0x319   :  { %v460_v17 = vadd.f32 %v459_v15, %v334_v11  ;;  %v461_v18 = vpop.f32.mrb[7].mxu0 }
 0x31a   :  { %v462_v20 = vadd.f32 %v461_v18, %v338_v13 }
 0x31b   :  { %v464_v21 = vpack.c.bf16 %v460_v17, %v456_v16 }
 0x31c   :  { %v465_v22 = vpack.c.bf16 %v462_v20, %v458_v19 }
 0x31e   :  { %1020 = vtanh.bf16 %v465_v22 }
 0x31f   :  { %1022 = vtanh.bf16 %v464_v21 }
 0x329   :  { %v1021_v23 = vpop.eup %1020 }
 0x32a   :  { %v1023_v24 = vpop.eup %1022  ;;  %635 = vmatprep.mubr.bf16.mxu1 %v1021_v23 }
 0x32b   :  { %636 = vmatmul.mubr.bf16.vlgmr.msra.gmra.mrb[4].mxu1 %v1023_v24 }
 0x3fe   :  { %v880_v27 = vpop.f32.mrb[4].mxu1 }
 0x3ff   :  { %v881_v28 = vpop.f32.mrb[5].mxu1 }
 0x400   :  { %v882_v29 = vadd.f32 %v881_v28, %v880_v27  ;;  %v883_v30 = vpop.f32.mrb[6].mxu1 }
 0x401   :  { %v884_v32 = vpop.f32.mrb[7].mxu1 }
 0x402   :  { %v885_v33 = vadd.f32 %v884_v32, %v883_v30  ;;  %v638_v34 = vadd.f32 %v882_v29, %v817_v31 }
 0x404   :  { %v641_v35 = vadd.f32 %v885_v33, %v817_v31 }
 0x406   :  { %v644_v36 = vpack.c.bf16 %v641_v35, %v638_v34 }
 0x408   :  { %940 = vmatmul.mubr.bf16.vlgmr.msra.gmra.mrb[8].mxu0 %v644_v36 }
 0x4db   :  { %v750_v37 = vpop.f32.mrb[8].mxu0 }
 0x4dc   :  { %v941_v38 = vpop.f32.mrb[9].mxu0  ;;  %v751_v40 = vadd.f32 %v834_v0, %v750_v37 }
 0x4dd   :  { %v753_v39 = vpop.f32.mrb[10].mxu0 }
 0x4de   :  { %v754_v41 = vadd.f32 %v834_v0, %v753_v39  ;;  %v942_v42 = vpop.f32.mrb[11].mxu0 }
 0x4e0   :  { %v850_v43 = vpack.c.bf16 %v754_v41, %v751_v40 }
 0x4e2   :  { %851 = vst [vmem:[#allocation13] sm:$0xff] %v850_v43  }
 0x4e3   :  { %1167 = shalt.err (!%p1164_p10)
}
 0x4e4   :  { %s1168_s3 = scalar_lea.hbm %s1435_s11, 128 }
 0x4e5   :  { %p1169_p11 = scmp.ne.s32.totalorder %s1435_s11, %s1168_s3  ;;  %p1172_p12 = scmp.lt.u32.totalorder %s1168_s3, %s1435_s11 }
 0x4e7   :  { %p1174_p13 = pnand %p1172_p12, %p1169_p11 }
 0x4e9   :  { %1177 = shalt.err (!%p1174_p13)
}
 0x4ea   :  { %778 = dma.vmem_to_hbm [thread:$0]  %s773_s23, 128, %s1435_s11, [#allocation4], %s1190_s29, %s1190_s29, %s1191_s30  }
 0x4eb   :  { %1186 = dma.done.wait [#allocation4], 128  }
 0x4ec   :  { %1187 = vsyncadd [#allocation4], 4294967168 }
 0x4ed   :  { %782 = vsyncpa [#allocation3], 1 }
 0x4ee   :  { %783 = vsyncpa [#allocation6], 1 }
 0x4ef   :  { %784 = vsyncpa [#allocation9], 1 }
 0x4f0   :  { %785 = vsyncpa [#allocation12], 1 }
 0x4f1   :  { %786 = vsyncpa [#allocation4], 1 }

</bundles_post_ra>
